<compile_context>
chip_gen: v6e
topology: v6e:2x2x1
jax: 0.10.0
libtpu: 0.0.40
codegen_flags: <defaults>
</compile_context>

<pallas_src>
import functools

import jax
import jax.numpy as jnp
from jax.experimental import pallas as pl
from jax.experimental.pallas import tpu as pltpu


def mlp_tanh_2h_kernel(x_ref, w1_ref, b1_ref, w2_ref, b2_ref, w3_ref, b3_ref,
                       o_ref, *, lane_dense_out):
    mx_dtype = w1_ref.dtype                 # MXU operand dtype (f32 or bf16)
    x = x_ref[...].astype(mx_dtype)

    # fc1 + tanh  (f32 accumulation / bias / activation)
    h1 = jnp.dot(x, w1_ref[...], preferred_element_type=jnp.float32)
    h1 = jnp.tanh(h1 + b1_ref[...].astype(jnp.float32))

    # fc2 + tanh
    h2 = jnp.dot(h1.astype(mx_dtype), w2_ref[...],
                 preferred_element_type=jnp.float32)
    h2 = jnp.tanh(h2 + b2_ref[...].astype(jnp.float32))
    h2 = h2.astype(mx_dtype)

    # fc3 (no activation)
    if lane_dense_out:
        # w3_ref is (out_dim, n_hid), b3_ref is (out_dim, 1).
        # y^T = w3^T . h2^T as an rhs-transposed MXU matmul -> (out_dim, TM):
        # the batch tile sits in the lane dim, so the final store is unmasked
        # (lane-dense) even for out_dim << 128.
        y = jax.lax.dot_general(w3_ref[...], h2, (((1,), (1,)), ((), ())),
                                preferred_element_type=jnp.float32)
    else:
        # w3_ref is (n_hid, out_dim), b3_ref is (1, out_dim).
        y = jnp.dot(h2, w3_ref[...], preferred_element_type=jnp.float32)
    y = y + b3_ref[...].astype(jnp.float32)
    o_ref[...] = y.astype(o_ref.dtype)


def _round_up(n, m):
    return ((n + m - 1) // m) * m


_VMEM_BUDGET = 44 << 20                # working-set target; fits v7x 64 MiB/TC
_VMEM_LIMIT_CAP = 56 << 20
_SINGLE_BUFFER_PARAMS_MIN_BYTES = 1 << 20


def mlp_tanh_2h(x, w1, b1, w2, b2, w3, b3, *, block_batch=1024,
                use_bf16_matmul=None):
    """x: (B, input_dim). Weights: (in, out). Biases of size out.

    use_bf16_matmul: True  -> bf16 MXU operands (f32 accumulation; ~1e-2 abs
                              deviation from a pure-f32 reference),
                     False -> operands stay in their given dtype,
                     None  -> auto (bf16 only if f32 weights blow the VMEM budget).
    Returns (B, output_dim) in x.dtype.
    """
    B, in_dim = x.shape
    n_hid = w1.shape[1]
    out_dim = w3.shape[1]
    out_dtype = x.dtype
    x_item = jnp.dtype(x.dtype).itemsize
    out_item = jnp.dtype(out_dtype).itemsize

    # ---- batch tile --------------------------------------------------------
    if B >= 128:
        TM = max(128, (min(block_batch, _round_up(B, 128)) // 128) * 128)
    else:
        TM = _round_up(max(B, 1), 8)
    # Large single-tile batches: split into >=2 grid steps so the "parallel"
    # axis actually spans both v7x TensorCores.
    if TM >= 256 and _round_up(B, TM) // TM < 2:
        TM = _round_up(TM // 2, 128)

    # ---- VMEM budget -------------------------------------------------------
    def _param_bytes(*arrs):
        return sum(int(a.size) * jnp.dtype(a.dtype).itemsize for a in arrs)

    def _tile_bytes(tm):
        return (2 * tm * in_dim * x_item          # x tile, double-buffered
                + 2 * tm * out_dim * out_item     # y tile, double-buffered
                + 2 * tm * n_hid * 4)             # live f32 h1 / h2 values

    cast_w_to_bf16 = use_bf16_matmul
    if cast_w_to_bf16 is None:
        # Keep f32 semantics unless resident f32 weights + tiles exceed the
        # v7x-safe budget; then prefer bf16 weights over losing residency.
        cast_w_to_bf16 = (
            w1.dtype == jnp.float32
            and _param_bytes(w1, b1, w2, b2, w3, b3) + _tile_bytes(TM) > _VMEM_BUDGET)
    if cast_w_to_bf16:
        w1, w2, w3 = (w.astype(jnp.bfloat16) for w in (w1, w2, w3))
    param_bytes = _param_bytes(w1, b1, w2, b2, w3, b3)
    while param_bytes + _tile_bytes(TM) > _VMEM_BUDGET and TM > 8:
        TM //= 2
        TM = (TM // 128) * 128 if TM >= 128 else max(8, (TM // 8) * 8)

    B_pad = _round_up(B, TM)
    grid = (B_pad // TM,)
    x_p = jnp.pad(x, ((0, B_pad - B), (0, 0))) if B_pad != B else x

    # Lane-dense store: out_dim < 128 would otherwise force masked vst.msk on
    # the single vector-store slot; store the tile transposed instead.
    lane_dense = out_dim < 128 and TM % 128 == 0

    b1_k = b1.reshape(1, n_hid)
    b2_k = b2.reshape(1, n_hid)
    if lane_dense:
        w3_k = w3.T                          # (out_dim, n_hid), tiny one-time op
        b3_k = b3.reshape(out_dim, 1)
        out_shape = jax.ShapeDtypeStruct((out_dim, B_pad), out_dtype)
        out_spec = pl.BlockSpec((out_dim, TM), lambda i: (0, i))
    else:
        w3_k = w3
        b3_k = b3.reshape(1, out_dim)
        out_shape = jax.ShapeDtypeStruct((B_pad, out_dim), out_dtype)
        out_spec = pl.BlockSpec((TM, out_dim), lambda i: (i, 0))

    # Weights/biases: full block, constant index_map -> VMEM-resident across
    # all batch tiles.  When large enough to matter, keep a single buffer
    # (they are never re-fetched) instead of the default double buffer.
    single_buffer = param_bytes >= _SINGLE_BUFFER_PARAMS_MIN_BYTES

    def resident(a):
        assert a.ndim == 2
        if single_buffer:
            return pl.BlockSpec(a.shape, lambda i: (0, 0),
                                pipeline_mode=pl.Buffered(1))
        return pl.BlockSpec(a.shape, lambda i: (0, 0))

    need = param_bytes + _tile_bytes(TM)
    vmem_limit = int(min(max(int(need * 1.25) + (2 << 20), 32 << 20),
                         _VMEM_LIMIT_CAP))

    cost = pl.CostEstimate(
        flops=2 * B_pad * (in_dim * n_hid + n_hid * n_hid + n_hid * out_dim),
        transcendentals=2 * B_pad * n_hid,
        bytes_accessed=(B_pad * in_dim * x_item
                        + B_pad * out_dim * out_item
                        + param_bytes),
    )

    out = pl.pallas_call(
        functools.partial(mlp_tanh_2h_kernel, lane_dense_out=lane_dense),
        out_shape=out_shape,
        grid=grid,
        in_specs=[
            pl.BlockSpec((TM, in_dim), lambda i: (i, 0)),
            resident(w1), resident(b1_k),
            resident(w2), resident(b2_k),
            resident(w3_k), resident(b3_k),
        ],
        out_specs=out_spec,
        compiler_params=pltpu.CompilerParams(
            dimension_semantics=("parallel",),
            vmem_limit_bytes=vmem_limit,
        ),
        cost_estimate=cost,
    )(x_p, w1, b1_k, w2, b2_k, w3_k, b3_k)

    if lane_dense:
        out = out.T                      # back to (B_pad, out_dim); plumbing only
    return out[:B] if B_pad != B else out


def init_params(key, input_dim, n_hid, output_dim, dtype=jnp.float32):
    """Deterministic init matching nn.Linear's U(-1/sqrt(fan_in), 1/sqrt(fan_in))."""
    ks = jax.random.split(key, 6)

    def linear(kw, kb, fan_in, fan_out):
        bound = 1.0 / jnp.sqrt(jnp.float32(fan_in))
        w = jax.random.uniform(kw, (fan_in, fan_out), dtype, -bound, bound)
        b = jax.random.uniform(kb, (1, fan_out), dtype, -bound, bound)
        return w, b

    w1, b1 = linear(ks[0], ks[1], input_dim, n_hid)
    w2, b2 = linear(ks[2], ks[3], n_hid, n_hid)
    w3, b3 = linear(ks[4], ks[5], n_hid, output_dim)
    return w1, b1, w2, b2, w3, b3


def _reference(x, w1, b1, w2, b2, w3, b3):
    h = jnp.tanh(x @ w1 + b1)
    h = jnp.tanh(h @ w2 + b2)
    return h @ w3 + b3


if __name__ == "__main__":
    input_dim, n_hid, output_dim = 16, 32, 8
    key = jax.random.PRNGKey(0)
    kx, kp, kx2, kx3 = jax.random.split(key, 4)
    w1, b1, w2, b2, w3, b3 = init_params(kp, input_dim, n_hid, output_dim)

    # Check 1: small batch -> single tile, natural (TM, out_dim) store, f32 MXU.
    x = jax.random.normal(kx, (8, input_dim), jnp.float32)
    y = mlp_tanh_2h(x, w1, b1, w2, b2, w3, b3)
    jax.block_until_ready(y)
    ref = _reference(x, w1, b1, w2, b2, w3, b3)
    assert y.shape == (8, output_dim)
    assert jnp.allclose(y, ref, atol=1e-4, rtol=1e-4)

    # Check 2: multi-tile grid + batch padding + lane-dense transposed store
    # (out_dim=8 << 128), still pure-f32 MXU operands.
    x2 = jax.random.normal(kx2, (200, input_dim), jnp.float32)
    y2 = mlp_tanh_2h(x2, w1, b1, w2, b2, w3, b3, block_batch=256)
    jax.block_until_ready(y2)
    ref2 = _reference(x2, w1, b1, w2, b2, w3, b3)
    assert y2.shape == (200, output_dim)
    assert jnp.allclose(y2, ref2, atol=1e-4, rtol=1e-4)

    # Check 3: large batch auto-split into >=2 grid steps (both v7x TCs) with
    # the reviewed bf16-operand MXU path (f32 accumulation); loose tolerance
    # vs the pure-f32 reference documents the bf16 deviation.
    x3 = jax.random.normal(kx3, (1024, input_dim), jnp.float32)
    y3 = mlp_tanh_2h(x3, w1, b1, w2, b2, w3, b3, use_bf16_matmul=True)
    jax.block_until_ready(y3)
    ref3 = _reference(x3, w1, b1, w2, b2, w3, b3)
    assert y3.shape == (1024, output_dim)
    assert jnp.allclose(y3, ref3, atol=1e-1, rtol=1e-1)

    print("KERNEL_OK")
</pallas_src>

<mosaic_0001>
module attributes {stable_mosaic.version = 11 : i64} {
  func.func @mlp_tanh_2h_kernel(%arg0: i32, %arg1: memref<8x16xf32, #tpu.memory_space<vmem>>, %arg2: memref<16x32xf32, #tpu.memory_space<vmem>>, %arg3: memref<1x32xf32, #tpu.memory_space<vmem>>, %arg4: memref<32x32xf32, #tpu.memory_space<vmem>>, %arg5: memref<1x32xf32, #tpu.memory_space<vmem>>, %arg6: memref<32x8xf32, #tpu.memory_space<vmem>>, %arg7: memref<1x8xf32, #tpu.memory_space<vmem>>, %arg8: memref<8x8xf32, #tpu.memory_space<vmem>>) attributes {dimension_semantics = [#tpu.dimension_semantics<parallel>], iteration_bounds = array<i64: 1>, scalar_prefetch = 0 : i64, scratch_operands = 0 : i64, tpu.core_type = #tpu.core_type<tc>, window_params = [{transform_indices = @transform_0, window_bounds = array<i64: 8, 16>}, {pipeline_mode = #tpu.pipeline_mode<synchronous>, transform_indices = @transform_1, window_bounds = array<i64: 16, 32>}, {pipeline_mode = #tpu.pipeline_mode<synchronous>, transform_indices = @transform_2, window_bounds = array<i64: 1, 32>}, {pipeline_mode = #tpu.pipeline_mode<synchronous>, transform_indices = @transform_3, window_bounds = array<i64: 32, 32>}, {pipeline_mode = #tpu.pipeline_mode<synchronous>, transform_indices = @transform_4, window_bounds = array<i64: 1, 32>}, {pipeline_mode = #tpu.pipeline_mode<synchronous>, transform_indices = @transform_5, window_bounds = array<i64: 32, 8>}, {pipeline_mode = #tpu.pipeline_mode<synchronous>, transform_indices = @transform_6, window_bounds = array<i64: 1, 8>}, {transform_indices = @transform_7, window_bounds = array<i64: 8, 8>}]} {
    %c0 = arith.constant 0 : index
    %c0_0 = arith.constant 0 : index
    %0 = vector.load %arg1[%c0, %c0_0] : memref<8x16xf32, #tpu.memory_space<vmem>>, vector<8x16xf32>
    %c0_1 = arith.constant 0 : index
    %c0_2 = arith.constant 0 : index
    %1 = vector.load %arg2[%c0_1, %c0_2] : memref<16x32xf32, #tpu.memory_space<vmem>>, vector<16x32xf32>
    %cst = arith.constant dense<0.000000e+00> : vector<8x32xf32>
    %2 = tpu.matmul %0, %1, %cst {dimension_numbers = #tpu.dot_dimension_numbers<[1], [0], [0], [1], [0, 0, 1, 1], [], []>} : vector<8x16xf32>, vector<16x32xf32>, vector<8x32xf32> -> vector<8x32xf32>
    %c0_3 = arith.constant 0 : index
    %c0_4 = arith.constant 0 : index
    %3 = vector.load %arg3[%c0_3, %c0_4] : memref<1x32xf32, #tpu.memory_space<vmem>>, vector<1x32xf32>
    %4 = vector.broadcast %3 : vector<1x32xf32> to vector<8x32xf32>
    %5 = arith.addf %2, %4 : vector<8x32xf32>
    %6 = math.tanh %5 : vector<8x32xf32>
    %c0_5 = arith.constant 0 : index
    %c0_6 = arith.constant 0 : index
    %7 = vector.load %arg4[%c0_5, %c0_6] : memref<32x32xf32, #tpu.memory_space<vmem>>, vector<32x32xf32>
    %cst_7 = arith.constant dense<0.000000e+00> : vector<8x32xf32>
    %8 = tpu.matmul %6, %7, %cst_7 {dimension_numbers = #tpu.dot_dimension_numbers<[1], [0], [0], [1], [0, 0, 1, 1], [], []>} : vector<8x32xf32>, vector<32x32xf32>, vector<8x32xf32> -> vector<8x32xf32>
    %c0_8 = arith.constant 0 : index
    %c0_9 = arith.constant 0 : index
    %9 = vector.load %arg5[%c0_8, %c0_9] : memref<1x32xf32, #tpu.memory_space<vmem>>, vector<1x32xf32>
    %10 = vector.broadcast %9 : vector<1x32xf32> to vector<8x32xf32>
    %11 = arith.addf %8, %10 : vector<8x32xf32>
    %12 = math.tanh %11 : vector<8x32xf32>
    %c0_10 = arith.constant 0 : index
    %c0_11 = arith.constant 0 : index
    %13 = vector.load %arg6[%c0_10, %c0_11] : memref<32x8xf32, #tpu.memory_space<vmem>>, vector<32x8xf32>
    %cst_12 = arith.constant dense<0.000000e+00> : vector<8x8xf32>
    %14 = tpu.matmul %12, %13, %cst_12 {dimension_numbers = #tpu.dot_dimension_numbers<[1], [0], [0], [1], [0, 0, 1, 1], [], []>} : vector<8x32xf32>, vector<32x8xf32>, vector<8x8xf32> -> vector<8x8xf32>
    %c0_13 = arith.constant 0 : index
    %c0_14 = arith.constant 0 : index
    %15 = vector.load %arg7[%c0_13, %c0_14] : memref<1x8xf32, #tpu.memory_space<vmem>>, vector<1x8xf32>
    %16 = vector.broadcast %15 : vector<1x8xf32> to vector<8x8xf32>
    %17 = arith.addf %14, %16 : vector<8x8xf32>
    %c0_15 = arith.constant 0 : index
    %c0_16 = arith.constant 0 : index
    %18 = vector.load %arg8[%c0_15, %c0_16] : memref<8x8xf32, #tpu.memory_space<vmem>>, vector<8x8xf32>
    tpu.vector_store %arg8[%c0_15, %c0_16], %17 {strides = array<i32>} : memref<8x8xf32, #tpu.memory_space<vmem>>, vector<8x8xf32>,
    return
  }
  func.func @transform_0(%arg0: i32) -> (i32, i32) {
    %c0_i32 = arith.constant 0 : i32
    %c0_i32_0 = arith.constant 0 : i32
    return %arg0, %c0_i32 : i32, i32
  }
  func.func @transform_1(%arg0: i32) -> (i32, i32) {
    %c0_i32 = arith.constant 0 : i32
    %c0_i32_0 = arith.constant 0 : i32
    %c0_i32_1 = arith.constant 0 : i32
    return %c0_i32, %c0_i32_0 : i32, i32
  }
  func.func @transform_2(%arg0: i32) -> (i32, i32) {
    %c0_i32 = arith.constant 0 : i32
    %c0_i32_0 = arith.constant 0 : i32
    %c0_i32_1 = arith.constant 0 : i32
    return %c0_i32, %c0_i32_0 : i32, i32
  }
  func.func @transform_3(%arg0: i32) -> (i32, i32) {
    %c0_i32 = arith.constant 0 : i32
    %c0_i32_0 = arith.constant 0 : i32
    %c0_i32_1 = arith.constant 0 : i32
    return %c0_i32, %c0_i32_0 : i32, i32
  }
  func.func @transform_4(%arg0: i32) -> (i32, i32) {
    %c0_i32 = arith.constant 0 : i32
    %c0_i32_0 = arith.constant 0 : i32
    %c0_i32_1 = arith.constant 0 : i32
    return %c0_i32, %c0_i32_0 : i32, i32
  }
  func.func @transform_5(%arg0: i32) -> (i32, i32) {
    %c0_i32 = arith.constant 0 : i32
    %c0_i32_0 = arith.constant 0 : i32
    %c0_i32_1 = arith.constant 0 : i32
    return %c0_i32, %c0_i32_0 : i32, i32
  }
  func.func @transform_6(%arg0: i32) -> (i32, i32) {
    %c0_i32 = arith.constant 0 : i32
    %c0_i32_0 = arith.constant 0 : i32
    %c0_i32_1 = arith.constant 0 : i32
    return %c0_i32, %c0_i32_0 : i32, i32
  }
  func.func @transform_7(%arg0: i32) -> (i32, i32) {
    %c0_i32 = arith.constant 0 : i32
    %c0_i32_0 = arith.constant 0 : i32
    return %arg0, %c0_i32 : i32, i32
  }
}

</mosaic_0001>

<bundles_post_ra>
// kernel: tpu_custom_call.1
= control target key start
LH: loop header
LB: loop body
LE: loop exit
PB: predicated region body
PF: predicated region fallthrough
CT: control target
= control target key end

     0   :  { %12 = vsyncpa [#allocation3], 0  ;;  %s542_s0 = inlined_call_operand.vmem [shape: f32[8,16], index: 0, kind: input, shape index: {}]   ;;  %s543_s1 = inlined_call_operand.hbm [shape: f32[16,32], index: 1, kind: input, shape index: {}]   ;;  %s544_s2 = inlined_call_operand.vmem [shape: f32[1,32], index: 2, kind: input, shape index: {}]   ;;  %s545_s3 = inlined_call_operand.vmem [shape: f32[32,32], index: 3, kind: input, shape index: {}]   ;;  %s546_s4 = inlined_call_operand.hbm [shape: f32[1,32], index: 4, kind: input, shape index: {}]   ;;  %s547_s5 = inlined_call_operand.vmem [shape: f32[32,8], index: 5, kind: input, shape index: {}]   ;;  %s548_s6 = inlined_call_operand.vmem [shape: f32[1,8], index: 6, kind: input, shape index: {}]   ;;  %s549_s7 = inlined_call_operand.hbm [shape: f32[8,8], index: 7, kind: output, shape index: {}]  }
   0x1   :  { %13 = vsyncpa [#allocation6], 0 }
   0x2   :  { %14 = vsyncpa [#allocation4], 0  ;;  %s451_s24 = smov [#allocation2]  }
   0x3   :  { %s22_s25 = sshll.u32 %s451_s24, 4  ;;  %s23_s25 = int_to_ptr.vmem [resolvable:$true] %s22_s25 }
   0x4   :  { %s393_s26 = scalar_lea.vmem %s23_s25, 256  ;;  %p398_p1 = scmp.lt.s32.totalorder %s23_s25, %s23_s25 }
   0x5   :  { %p394_p0 = scmp.ne.s32.totalorder %s23_s25, %s393_s26  ;;  %p399_p2 = scmp.lt.s32.totalorder %s393_s26, %s393_s26 }
   0x7   :  { %p400_p3 = por %p399_p2, %p398_p1 }
   0x9   :  { %p401_p4 = pnand %p400_p3, %p394_p0 }
   0xb   :  { %404 = shalt.err (!%p401_p4)
}
   0xc   :  { %s452_s27 = smov 128   ;;  %s453_s28 = smov 8  }
   0xd   :  { %28 = dma.hbm_to_vmem [thread:$0]  %s543_s1, 256, %s23_s25, [#allocation3], %s452_s27, %s452_s27, %s453_s28  }
   0xe   :  { %s454_s8 = smov [#allocation5]  }
   0xf   :  { %s39_s9 = sshll.u32 %s454_s8, 4  ;;  %s40_s9 = int_to_ptr.vmem [resolvable:$true] %s39_s9 }
  0x10   :  { %s413_s10 = scalar_lea.vmem %s40_s9, 16  ;;  %s417_s11 = scalar_lea.vmem %s40_s9, 32 }
  0x11   :  { %p414_p5 = scmp.ne.s32.totalorder %s40_s9, %s413_s10  ;;  %p418_p6 = scmp.lt.s32.totalorder %s40_s9, %s40_s9 }
  0x12   :  { %p419_p7 = scmp.lt.s32.totalorder %s417_s11, %s413_s10 }
  0x14   :  { %p420_p8 = por %p419_p7, %p418_p6 }
  0x16   :  { %p421_p9 = pnand %p420_p8, %p414_p5 }
  0x18   :  { %424 = shalt.err (!%p421_p9)
}
  0x19   :  { %42 = dma.hbm_to_vmem [thread:$0]  %s546_s4, 16, %s40_s9, [#allocation6]  }
  0x1a   :  { %445 = dma.done.wait [#allocation3], 256  }
  0x1b   :  { %446 = vsyncadd [#allocation3], 4294967040 }
  0x1c   :  { %447 = dma.done.wait [#allocation6], 16  }
  0x1d   :  { %448 = vsyncadd [#allocation6], 4294967280  ;;  %v455_v0 = vmov 0.0   ;;  %vm456_vm0 = vmmov 0   ;;  %v55_v1 = vld [vmem:[#allocation2 + $0x8] sm:$0xff]  ;;  %v54_v2 = vld [vmem:[#allocation2] sm:$0xff] }
  0x1e   :  { %345 = vmatprep.subr.mxu0 %v455_v0  ;;  %349 = vmatprep.mubr.msk.f32.mxu0 %vm456_vm0, %v455_v0  ;;  %v53_v3 = vld [vmem:[%s542_s0] sm:$0xff]  ;;  %vm63_vm1 = vcmask 130048   ;;  %v141_v4 = vld [vmem:[%s545_s3 + $0x18] sm:$0xff]  ;;  %v140_v5 = vld [vmem:[%s545_s3 + $0x10] sm:$0xff]  ;;  %vm149_vm2 = vcmask 261120   ;;  %s457_s8 = smov [#allocation7]  }
  0x1f   :  { %352 = vmatprep.subr.mxu1 %v455_v0  ;;  %360 = vmatprep.mubr.msk.f32.mxu1 %vm456_vm0, %v455_v0  ;;  %v139_v6 = vld [vmem:[%s545_s3 + $0x8] sm:$0xff]  ;;  %v138_v7 = vld [vmem:[%s545_s3] sm:$0xff]  ;;  %v227_v13 = vld [vmem:[%s547_s5 + $0x18] sm:$0xff]  ;;  %s316_s9 = sshll.u32 %s457_s8, 4  ;;  %vm308_vm3 = vcmask 64512   ;;  %s317_s9 = int_to_ptr.vmem [resolvable:$true] %s316_s9 }
  0x20   :  { %346 = vmatpush3.msra.mxu0 %v55_v1  ;;  %353 = vmatpush3.msra.mxu1 %v141_v4  ;;  %v326_v8 = vld [vmem:[%s544_s2] ss:$0 sm:$0xff]  ;;  %v226_v14 = vld [vmem:[%s547_s5 + $0x10] sm:$0xff]  ;;  %v225_v15 = vld [vmem:[%s547_s5 + $0x8] sm:$0xff]  ;;  %p430_p11 = scmp.lt.s32.totalorder %s317_s9, %s317_s9 }
  0x21   :  { %347 = vmatprep.subr.mxu0 %v455_v0  ;;  %354 = vmatprep.subr.mxu1 %v455_v0  ;;  %v224_v16 = vld [vmem:[%s547_s5] sm:$0xff]  ;;  %v328_v17 = vld [vmem:[#allocation5] ss:$0 sm:$0xff]  ;;  %s425_s5 = scalar_lea.vmem %s317_s9, 128 }
  0x22   :  { %348 = vmatpush3.msra.mxu0 %v54_v2  ;;  %355 = vmatpush3.msra.mxu1 %v140_v5  ;;  %v330_v22 = vld [vmem:[%s548_s6] ss:$0 sm:$0xff]  ;;  %p426_p10 = scmp.ne.s32.totalorder %s317_s9, %s425_s5  ;;  %p431_p12 = scmp.lt.s32.totalorder %s425_s5, %s425_s5 }
  0x23   :  { %350 = vmatmul.mubr.msk.f32.vlgmr.msra.gmra.mxu0 %vm63_vm1, %v53_v3  ;;  %363 = vmatprep.subr.mxu0 %v455_v0 }
  0x24   :  { %371 = vmatprep.mubr.msk.f32.mxu0 %vm456_vm0, %v455_v0  ;;  %356 = vmatprep.subr.mxu1 %v455_v0  ;;  %p432_p13 = por %p431_p12, %p430_p11 }
  0x25   :  { %357 = vmatpush3.msra.mxu1 %v139_v6  ;;  %364 = vmatpush3.msra.mxu0 %v227_v13 }
  0x26   :  { %358 = vmatprep.subr.mxu1 %v455_v0  ;;  %365 = vmatprep.subr.mxu0 %v455_v0  ;;  %p433_p0 = pnand %p432_p13, %p426_p10 }
  0x27   :  { %359 = vmatpush3.msra.mxu1 %v138_v7  ;;  %366 = vmatpush3.msra.mxu0 %v226_v14 }
  0x28   :  { %367 = vmatprep.subr.mxu0 %v455_v0 }
  0x29   :  { %368 = vmatpush3.msra.mxu0 %v225_v15 }
  0x2a   :  { %369 = vmatprep.subr.mxu0 %v455_v0 }
  0x2b   :  { %370 = vmatpush3.msra.mxu0 %v224_v16 }
  0xe3   :  { %v133_v9 = vpop.f32.mrf.mxu0 }
  0xe4   :  { %v134_v10 = vadd.f32 %v326_v8, %v133_v9 }
  0xe5   :  { %v351_v11 = vpop.f32.mrf.mxu0 }
  0xe6   :  { %381 = vtanh.f32 %v134_v10 }
  0xf3   :  { %v382_v12 = vpop.eup %381 }
  0xf4   :  { %361 = vmatmul.mubr.msk.f32.vlgmr.msra.gmra.mxu1 %vm149_vm2, %v382_v12 }
 0x1b4   :  { %v219_v18 = vpop.f32.mrf.mxu1 }
 0x1b5   :  { %v220_v19 = vadd.f32 %v328_v17, %v219_v18 }
 0x1b6   :  { %v362_v20 = vpop.f32.mrf.mxu1 }
 0x1b7   :  { %383 = vtanh.f32 %v220_v19 }
 0x1c4   :  { %v384_v21 = vpop.eup %383 }
 0x1c5   :  { %372 = vmatmul.mubr.msk.f32.vlgmr.msra.gmra.mxu0 %vm149_vm2, %v384_v21 }
 0x285   :  { %v304_v23 = vpop.f32.mrf.mxu0 }
 0x286   :  { %v305_v24 = vadd.f32 %v330_v22, %v304_v23 }
 0x287   :  { %v373_v25 = vpop.f32.mrf.mxu0 }
 0x288   :  { %309 = vst.msk [vmem:[#allocation7] sm:$0xff] %vm308_vm3, %v305_v24 }
 0x289   :  { %436 = shalt.err (!%p433_p0)
}
 0x28a   :  { %319 = dma.vmem_to_hbm [thread:$0]  %s317_s9, 128, %s549_s7, [#allocation4]  }
 0x28b   :  { %449 = dma.done.wait [#allocation4], 128  }
 0x28c   :  { %450 = vsyncadd [#allocation4], 4294967168 }
 0x28d   :  { %323 = vsyncpa [#allocation3], 1 }
 0x28e   :  { %324 = vsyncpa [#allocation6], 1 }
 0x28f   :  { %325 = vsyncpa [#allocation4], 1 }

</bundles_post_ra>
